<compile_context>
chip_gen: v6e
topology: v6e:2x2x1
jax: 0.10.0
libtpu: 0.0.40
codegen_flags: <defaults>
</compile_context>

<pallas_src>
import functools

import jax
import jax.numpy as jnp
import numpy as np
from jax.experimental import pallas as pl
from jax.experimental.pallas import tpu as pltpu

HIDDEN = 256


def _round_up(n: int, m: int) -> int:
    return ((n + m - 1) // m) * m


# ---------------------------------------------------------------------------
# Kernel
# ---------------------------------------------------------------------------
def _actor_kernel(x_ref, w1_ref, b1_ref, w2_ref, b2_ref, w3_ref, b3_ref,
                  wo_ref, bo_ref, o_ref, *, max_action: float):
    # fc1 + relu  (bf16 in, f32 accumulate)
    h = jnp.dot(x_ref[...], w1_ref[...], preferred_element_type=jnp.float32)
    h = jnp.maximum(h + b1_ref[...], 0.0)
    # fc2 + relu
    h = jnp.dot(h.astype(jnp.bfloat16), w2_ref[...],
                preferred_element_type=jnp.float32)
    h = jnp.maximum(h + b2_ref[...], 0.0)
    # fc3 + relu
    h = jnp.dot(h.astype(jnp.bfloat16), w3_ref[...],
                preferred_element_type=jnp.float32)
    h = jnp.maximum(h + b3_ref[...], 0.0)
    # action_out + scaled tanh
    a = jnp.dot(h.astype(jnp.bfloat16), wo_ref[...],
                preferred_element_type=jnp.float32) + bo_ref[...]
    o_ref[...] = (max_action * jnp.tanh(a)).astype(o_ref.dtype)


# ---------------------------------------------------------------------------
# One-time parameter preparation (padding + bf16 cast), hoisted out of the
# per-call hot path.
# ---------------------------------------------------------------------------
def prepare_padded_params(params, din: int, action: int):
    """Pad to TPU-friendly shapes and cast weights to bf16 (biases stay f32)."""
    w1, b1, w2, b2, w3, b3, wo, bo = params
    H = w1.shape[1]
    Dp = _round_up(din, 128)
    Ap = _round_up(action, 128)

    w1_p = jnp.zeros((Dp, H), jnp.bfloat16).at[:din, :].set(
        w1.astype(jnp.bfloat16))
    w2_p = w2.astype(jnp.bfloat16)
    w3_p = w3.astype(jnp.bfloat16)
    wo_p = jnp.zeros((H, Ap), jnp.bfloat16).at[:, :action].set(
        wo.astype(jnp.bfloat16))

    b1_p = b1.reshape(1, H).astype(jnp.float32)
    b2_p = b2.reshape(1, H).astype(jnp.float32)
    b3_p = b3.reshape(1, H).astype(jnp.float32)
    bo_p = jnp.zeros((1, Ap), jnp.float32).at[:, :action].set(
        bo.reshape(1, -1).astype(jnp.float32))

    meta = dict(din=din, action=action, hidden=H, dp=Dp, ap=Ap)
    return (w1_p, b1_p, w2_p, b2_p, w3_p, b3_p, wo_p, bo_p), meta


# ---------------------------------------------------------------------------
# Forward wrapper (hot path: only pads/casts x, calls the fused kernel).
# ---------------------------------------------------------------------------
def actor_forward(x, padded_params, meta, max_action: float):
    """x: (B, obs+goal) float32.  Returns (B, action) float32."""
    w1_p, b1_p, w2_p, b2_p, w3_p, b3_p, wo_p, bo_p = padded_params
    B, Din = x.shape
    H, Dp, Ap, A = meta["hidden"], meta["dp"], meta["ap"], meta["action"]
    assert Din == meta["din"]

    Bp = _round_up(max(B, 8), 8)
    x_p = jnp.zeros((Bp, Dp), jnp.bfloat16).at[:B, :Din].set(
        x.astype(jnp.bfloat16))

    full = lambda shape: pl.BlockSpec(shape, lambda: tuple(0 for _ in shape))

    flops = 2 * Bp * (Dp * H + H * H + H * H + H * Ap)
    bytes_accessed = (
        x_p.size * 2 + Bp * Ap * 4                       # activations in/out
        + (Dp * H + H * H + H * H + H * Ap) * 2          # bf16 weights
        + (3 * H + Ap) * 4                               # f32 biases
    )

    out = pl.pallas_call(
        functools.partial(_actor_kernel, max_action=float(max_action)),
        out_shape=jax.ShapeDtypeStruct((Bp, Ap), jnp.float32),
        grid=(),
        in_specs=[
            full((Bp, Dp)),   # x
            full((Dp, H)),    # w1
            full((1, H)),     # b1
            full((H, H)),     # w2
            full((1, H)),     # b2
            full((H, H)),     # w3
            full((1, H)),     # b3
            full((H, Ap)),    # wo
            full((1, Ap)),    # bo
        ],
        out_specs=full((Bp, Ap)),
        compiler_params=pltpu.CompilerParams(vmem_limit_bytes=4 << 20),
        cost_estimate=pl.CostEstimate(
            flops=flops, transcendentals=Bp * Ap,
            bytes_accessed=bytes_accessed),
    )(x_p, w1_p, b1_p, w2_p, b2_p, w3_p, b3_p, wo_p, bo_p)

    return out[:B, :A]


# ---------------------------------------------------------------------------
# Init + references
# ---------------------------------------------------------------------------
def init_params(key, obs, goal, action, hidden=HIDDEN):
    """Deterministic PyTorch-nn.Linear-style (uniform +-1/sqrt(fan_in)) init."""
    dims = [(obs + goal, hidden), (hidden, hidden), (hidden, hidden),
            (hidden, action)]
    params = []
    for (fan_in, fan_out) in dims:
        key, kw, kb = jax.random.split(key, 3)
        bound = 1.0 / np.sqrt(fan_in)
        w = jax.random.uniform(kw, (fan_in, fan_out), jnp.float32, -bound, bound)
        b = jax.random.uniform(kb, (fan_out,), jnp.float32, -bound, bound)
        params.extend([w, b])
    return tuple(params)


def actor_reference_f32(x, params, max_action):
    w1, b1, w2, b2, w3, b3, wo, bo = params
    h = jax.nn.relu(x @ w1 + b1)
    h = jax.nn.relu(h @ w2 + b2)
    h = jax.nn.relu(h @ w3 + b3)
    return max_action * jnp.tanh(h @ wo + bo)


def actor_reference_bf16(x, padded_params, meta, max_action):
    """Emulates the kernel's bf16-weight / f32-accumulate arithmetic."""
    w1_p, b1_p, w2_p, b2_p, w3_p, b3_p, wo_p, bo_p = padded_params
    B, Din = x.shape
    Dp, Ap, A = meta["dp"], meta["ap"], meta["action"]
    Bp = _round_up(max(B, 8), 8)
    x_p = jnp.zeros((Bp, Dp), jnp.bfloat16).at[:B, :Din].set(
        x.astype(jnp.bfloat16))
    dot = lambda a, b: jnp.dot(a, b, preferred_element_type=jnp.float32)
    h = jnp.maximum(dot(x_p, w1_p) + b1_p, 0.0)
    h = jnp.maximum(dot(h.astype(jnp.bfloat16), w2_p) + b2_p, 0.0)
    h = jnp.maximum(dot(h.astype(jnp.bfloat16), w3_p) + b3_p, 0.0)
    a = dot(h.astype(jnp.bfloat16), wo_p) + bo_p
    return (max_action * jnp.tanh(a))[:B, :A]


# ---------------------------------------------------------------------------
if __name__ == "__main__":
    # env_params: obs=10, goal=3, action=4, action_max=1.0
    env_params = {"obs": 10, "goal": 3, "action": 4, "action_max": 1.0}
    B = 2
    Din = env_params["obs"] + env_params["goal"]

    key = jax.random.PRNGKey(0)
    key, kx = jax.random.split(key)
    x = jax.random.normal(kx, (B, Din), jnp.float32)

    params = init_params(key, env_params["obs"], env_params["goal"],
                         env_params["action"])

    # One-time parameter prep (padding + bf16 cast) — NOT in the hot path.
    padded_params, meta = prepare_padded_params(params, Din,
                                                env_params["action"])

    actions = actor_forward(x, padded_params, meta, env_params["action_max"])
    actions = jax.block_until_ready(actions)

    # Tight check against a reference using the same bf16-quantized weights.
    ref_bf16 = actor_reference_bf16(x, padded_params, meta,
                                    env_params["action_max"])
    np.testing.assert_allclose(np.asarray(actions), np.asarray(ref_bf16),
                               rtol=2e-3, atol=2e-3)

    # Loose sanity check against the full-f32 PyTorch-equivalent reference.
    ref_f32 = actor_reference_f32(x, params, env_params["action_max"])
    np.testing.assert_allclose(np.asarray(actions), np.asarray(ref_f32),
                               rtol=5e-2, atol=5e-2)

    print("KERNEL_OK")
</pallas_src>

<mosaic_0001>
module attributes {stable_mosaic.version = 11 : i64} {
  func.func @_actor_kernel(%arg0: memref<8x128xbf16, #tpu.memory_space<vmem>>, %arg1: memref<128x256xbf16, #tpu.memory_space<vmem>>, %arg2: memref<1x256xf32, #tpu.memory_space<vmem>>, %arg3: memref<256x256xbf16, #tpu.memory_space<vmem>>, %arg4: memref<1x256xf32, #tpu.memory_space<vmem>>, %arg5: memref<256x256xbf16, #tpu.memory_space<vmem>>, %arg6: memref<1x256xf32, #tpu.memory_space<vmem>>, %arg7: memref<256x128xbf16, #tpu.memory_space<vmem>>, %arg8: memref<1x128xf32, #tpu.memory_space<vmem>>, %arg9: memref<8x128xf32, #tpu.memory_space<vmem>>) attributes {dimension_semantics = [], scalar_prefetch = 0 : i64, scratch_operands = 0 : i64, tpu.core_type = #tpu.core_type<tc>} {
    %c0 = arith.constant 0 : index
    %c0_0 = arith.constant 0 : index
    %0 = vector.load %arg0[%c0, %c0_0] : memref<8x128xbf16, #tpu.memory_space<vmem>>, vector<8x128xbf16>
    %c0_1 = arith.constant 0 : index
    %c0_2 = arith.constant 0 : index
    %1 = vector.load %arg1[%c0_1, %c0_2] : memref<128x256xbf16, #tpu.memory_space<vmem>>, vector<128x256xbf16>
    %cst = arith.constant dense<0.000000e+00> : vector<8x256xf32>
    %2 = tpu.matmul %0, %1, %cst {dimension_numbers = #tpu.dot_dimension_numbers<[1], [0], [0], [1], [0, 0, 1, 1], [], []>} : vector<8x128xbf16>, vector<128x256xbf16>, vector<8x256xf32> -> vector<8x256xf32>
    %c0_3 = arith.constant 0 : index
    %c0_4 = arith.constant 0 : index
    %3 = vector.load %arg2[%c0_3, %c0_4] : memref<1x256xf32, #tpu.memory_space<vmem>>, vector<1x256xf32>
    %4 = vector.broadcast %3 : vector<1x256xf32> to vector<8x256xf32>
    %5 = arith.addf %2, %4 : vector<8x256xf32>
    %cst_5 = arith.constant 0.000000e+00 : f32
    %6 = vector.broadcast %cst_5 : f32 to vector<8x256xf32>
    %7 = arith.maximumf %5, %6 : vector<8x256xf32>
    %8 = arith.truncf %7 : vector<8x256xf32> to vector<8x256xbf16>
    %c0_6 = arith.constant 0 : index
    %c0_7 = arith.constant 0 : index
    %9 = vector.load %arg3[%c0_6, %c0_7] : memref<256x256xbf16, #tpu.memory_space<vmem>>, vector<256x256xbf16>
    %cst_8 = arith.constant dense<0.000000e+00> : vector<8x256xf32>
    %10 = tpu.matmul %8, %9, %cst_8 {dimension_numbers = #tpu.dot_dimension_numbers<[1], [0], [0], [1], [0, 0, 1, 1], [], []>} : vector<8x256xbf16>, vector<256x256xbf16>, vector<8x256xf32> -> vector<8x256xf32>
    %c0_9 = arith.constant 0 : index
    %c0_10 = arith.constant 0 : index
    %11 = vector.load %arg4[%c0_9, %c0_10] : memref<1x256xf32, #tpu.memory_space<vmem>>, vector<1x256xf32>
    %12 = vector.broadcast %11 : vector<1x256xf32> to vector<8x256xf32>
    %13 = arith.addf %10, %12 : vector<8x256xf32>
    %cst_11 = arith.constant 0.000000e+00 : f32
    %14 = vector.broadcast %cst_11 : f32 to vector<8x256xf32>
    %15 = arith.maximumf %13, %14 : vector<8x256xf32>
    %16 = arith.truncf %15 : vector<8x256xf32> to vector<8x256xbf16>
    %c0_12 = arith.constant 0 : index
    %c0_13 = arith.constant 0 : index
    %17 = vector.load %arg5[%c0_12, %c0_13] : memref<256x256xbf16, #tpu.memory_space<vmem>>, vector<256x256xbf16>
    %cst_14 = arith.constant dense<0.000000e+00> : vector<8x256xf32>
    %18 = tpu.matmul %16, %17, %cst_14 {dimension_numbers = #tpu.dot_dimension_numbers<[1], [0], [0], [1], [0, 0, 1, 1], [], []>} : vector<8x256xbf16>, vector<256x256xbf16>, vector<8x256xf32> -> vector<8x256xf32>
    %c0_15 = arith.constant 0 : index
    %c0_16 = arith.constant 0 : index
    %19 = vector.load %arg6[%c0_15, %c0_16] : memref<1x256xf32, #tpu.memory_space<vmem>>, vector<1x256xf32>
    %20 = vector.broadcast %19 : vector<1x256xf32> to vector<8x256xf32>
    %21 = arith.addf %18, %20 : vector<8x256xf32>
    %cst_17 = arith.constant 0.000000e+00 : f32
    %22 = vector.broadcast %cst_17 : f32 to vector<8x256xf32>
    %23 = arith.maximumf %21, %22 : vector<8x256xf32>
    %24 = arith.truncf %23 : vector<8x256xf32> to vector<8x256xbf16>
    %c0_18 = arith.constant 0 : index
    %c0_19 = arith.constant 0 : index
    %25 = vector.load %arg7[%c0_18, %c0_19] : memref<256x128xbf16, #tpu.memory_space<vmem>>, vector<256x128xbf16>
    %cst_20 = arith.constant dense<0.000000e+00> : vector<8x128xf32>
    %26 = tpu.matmul %24, %25, %cst_20 {dimension_numbers = #tpu.dot_dimension_numbers<[1], [0], [0], [1], [0, 0, 1, 1], [], []>} : vector<8x256xbf16>, vector<256x128xbf16>, vector<8x128xf32> -> vector<8x128xf32>
    %c0_21 = arith.constant 0 : index
    %c0_22 = arith.constant 0 : index
    %27 = vector.load %arg8[%c0_21, %c0_22] : memref<1x128xf32, #tpu.memory_space<vmem>>, vector<1x128xf32>
    %28 = vector.broadcast %27 : vector<1x128xf32> to vector<8x128xf32>
    %29 = arith.addf %26, %28 : vector<8x128xf32>
    %30 = math.tanh %29 : vector<8x128xf32>
    %cst_23 = arith.constant 1.000000e+00 : f32
    %31 = vector.broadcast %cst_23 : f32 to vector<8x128xf32>
    %32 = arith.mulf %31, %30 : vector<8x128xf32>
    %c0_24 = arith.constant 0 : index
    %c0_25 = arith.constant 0 : index
    %33 = vector.load %arg9[%c0_24, %c0_25] : memref<8x128xf32, #tpu.memory_space<vmem>>, vector<8x128xf32>
    tpu.vector_store %arg9[%c0_24, %c0_25], %32 {strides = array<i32>} : memref<8x128xf32, #tpu.memory_space<vmem>>, vector<8x128xf32>,
    return
  }
}

</mosaic_0001>

<bundles_post_ra>
// kernel: tpu_custom_call.1
= control target key start
LH: loop header
LB: loop body
LE: loop exit
PB: predicated region body
PF: predicated region fallthrough
CT: control target
= control target key end

     0   :  { %14 = vsyncpa [#allocation3], 0  ;;  %s1452_s0 = inlined_call_operand.hbm [shape: bf16[8,128], index: 0, kind: input, shape index: {}]   ;;  %s1453_s1 = inlined_call_operand.hbm [shape: bf16[128,256], index: 1, kind: input, shape index: {}]   ;;  %s1454_s2 = inlined_call_operand.vmem [shape: f32[1,256], index: 2, kind: input, shape index: {}]   ;;  %s1455_s3 = inlined_call_operand.hbm [shape: bf16[256,256], index: 3, kind: input, shape index: {}]   ;;  %s1456_s4 = inlined_call_operand.vmem [shape: f32[1,256], index: 4, kind: input, shape index: {}]   ;;  %s1457_s5 = inlined_call_operand.hbm [shape: bf16[256,256], index: 5, kind: input, shape index: {}]   ;;  %s1458_s6 = inlined_call_operand.vmem [shape: f32[1,256], index: 6, kind: input, shape index: {}]   ;;  %s1459_s7 = inlined_call_operand.hbm [shape: bf16[256,128], index: 7, kind: input, shape index: {}]   ;;  %s1460_s8 = inlined_call_operand.vmem [shape: f32[1,128], index: 8, kind: input, shape index: {}]   ;;  %s1461_s9 = inlined_call_operand.hbm [shape: f32[8,128], index: 9, kind: output, shape index: {}]  }
   0x1   :  { %15 = vsyncpa [#allocation6], 0 }
   0x2   :  { %16 = vsyncpa [#allocation9], 0 }
   0x3   :  { %17 = vsyncpa [#allocation4], 0  ;;  %s1342_s30 = smov [#allocation5]  }
   0x4   :  { %s33_s10 = sshll.u32 %s1342_s30, 4  ;;  %s34_s10 = int_to_ptr.vmem [resolvable:$true] %s33_s10 }
   0x5   :  { %s1222_s11 = scalar_lea.vmem %s34_s10, 2048  ;;  %p1227_p1 = scmp.lt.s32.totalorder %s34_s10, %s34_s10 }
   0x6   :  { %p1223_p0 = scmp.ne.s32.totalorder %s34_s10, %s1222_s11  ;;  %p1228_p2 = scmp.lt.s32.totalorder %s1222_s11, %s1222_s11 }
   0x8   :  { %p1229_p3 = por %p1228_p2, %p1227_p1 }
   0xa   :  { %p1230_p4 = pnand %p1229_p3, %p1223_p0 }
   0xc   :  { %1233 = shalt.err (!%p1230_p4)
}
   0xd   :  { %s1343_s12 = smov 128   ;;  %s1344_s13 = smov 8  }
   0xe   :  { %39 = dma.hbm_to_vmem [thread:$0]  %s1453_s1, 2048, %s34_s10, [#allocation6], %s1343_s12, %s1343_s12, %s1344_s13  }
   0xf   :  { %s1345_s16 = smov [#allocation8]   ;;  %s1346_s18 = smov [#allocation2]  }
  0x10   :  { %s61_s17 = sshll.u32 %s1345_s16, 4  ;;  %s24_s19 = sshll.u32 %s1346_s18, 4  ;;  %s62_s17 = int_to_ptr.vmem [resolvable:$true] %s61_s17  ;;  %s25_s19 = int_to_ptr.vmem [resolvable:$true] %s24_s19 }
  0x11   :  { %s1242_s20 = scalar_lea.vmem %s62_s17, 4096  ;;  %p1247_p6 = scmp.lt.s32.totalorder %s62_s17, %s62_s17 }
  0x12   :  { %p1243_p5 = scmp.ne.s32.totalorder %s62_s17, %s1242_s20  ;;  %p1248_p7 = scmp.lt.s32.totalorder %s1242_s20, %s1242_s20 }
  0x14   :  { %p1249_p8 = por %p1248_p7, %p1247_p6 }
  0x16   :  { %p1250_p9 = pnand %p1249_p8, %p1243_p5 }
  0x18   :  { %1253 = shalt.err (!%p1250_p9)
}
  0x19   :  { %67 = dma.hbm_to_vmem [thread:$0]  %s1457_s5, 4096, %s62_s17, [#allocation9], %s1343_s12, %s1343_s12, %s1344_s13  }
  0x1a   :  { %s1262_s1 = scalar_lea.vmem %s25_s19, 64  ;;  %p1267_p11 = scmp.lt.s32.totalorder %s25_s19, %s25_s19 }
  0x1b   :  { %p1263_p10 = scmp.ne.s32.totalorder %s25_s19, %s1262_s1  ;;  %p1268_p12 = scmp.lt.s32.totalorder %s1262_s1, %s1262_s1 }
  0x1d   :  { %p1269_p13 = por %p1268_p12, %p1267_p11 }
  0x1f   :  { %p1270_p0 = pnand %p1269_p13, %p1263_p10 }
  0x21   :  { %1273 = shalt.err (!%p1270_p0)
}
  0x22   :  { %27 = dma.hbm_to_vmem [thread:$0]  %s1452_s0, 64, %s25_s19, [#allocation3]  }
  0x23   :  { %s1347_s25 = smov [#allocation7]   ;;  %s1348_s27 = smov [#allocation10]  }
  0x24   :  { %s47_s26 = sshll.u32 %s1347_s25, 4  ;;  %s75_s28 = sshll.u32 %s1348_s27, 4  ;;  %s48_s26 = int_to_ptr.vmem [resolvable:$true] %s47_s26  ;;  %s76_s28 = int_to_ptr.vmem [resolvable:$true] %s75_s28 }
  0x25   :  { %s1282_s29 = scalar_lea.vmem %s48_s26, 4096  ;;  %p1287_p2 = scmp.lt.s32.totalorder %s48_s26, %s48_s26 }
  0x26   :  { %p1283_p1 = scmp.ne.s32.totalorder %s48_s26, %s1282_s29  ;;  %p1288_p3 = scmp.lt.s32.totalorder %s1282_s29, %s1282_s29 }
  0x28   :  { %p1289_p4 = por %p1288_p3, %p1287_p2 }
  0x2a   :  { %p1290_p5 = pnand %p1289_p4, %p1283_p1 }
  0x2c   :  { %1293 = shalt.err (!%p1290_p5)
}
  0x2d   :  { %53 = dma.hbm_to_vmem [thread:$0]  %s1455_s3, 4096, %s48_s26, [#allocation6], %s1343_s12, %s1343_s12, %s1344_s13  }
  0x2e   :  { %s1302_s0 = scalar_lea.vmem %s76_s28, 2048  ;;  %p1307_p7 = scmp.lt.s32.totalorder %s76_s28, %s76_s28 }
  0x2f   :  { %p1303_p6 = scmp.ne.s32.totalorder %s76_s28, %s1302_s0  ;;  %p1308_p8 = scmp.lt.s32.totalorder %s1302_s0, %s1302_s0 }
  0x31   :  { %p1309_p9 = por %p1308_p8, %p1307_p7 }
  0x33   :  { %p1310_p10 = pnand %p1309_p9, %p1303_p6 }
  0x35   :  { %1313 = shalt.err (!%p1310_p10)
}
  0x36   :  { %s1349_s10 = smov 64   ;;  %s1350_s11 = smov 4  }
  0x37   :  { %81 = dma.hbm_to_vmem [thread:$0]  %s1459_s7, 2048, %s76_s28, [#allocation9], %s1349_s10, %s1349_s10, %s1350_s11  }
  0x38   :  { %1334 = dma.done.wait [#allocation3], 64  }
  0x39   :  { %1335 = vsyncadd [#allocation3], 4294967232 }
  0x3a   :  { %1336 = dma.done.wait [#allocation6], 6144  }
  0x3b   :  { %1337 = vsyncadd [#allocation6], 4294961152 }
  0x3c   :  { %1338 = dma.done.wait [#allocation9], 6144  }
  0x3d   :  { %1339 = vsyncadd [#allocation9], 4294961152  ;;  %v1351_v0 = vmov 0   ;;  %v1076_v1 = vld [vmem:[#allocation5 + $0x74] ss:$8 sps:$4 sm:$0xff]  }
  0x3e   :  { %241 = vmatprep.mubr.bf16.mxu0 %v1351_v0  ;;  %v1078_v2 = vld [vmem:[#allocation5 + $0x70] ss:$8 sps:$4 sm:$0xff]   ;;  %209 = vmatprep.subr.bf16.mxu0 %v1076_v1  ;;  %v1079_v3 = vld [vmem:[#allocation5 + $0x64] ss:$8 sps:$4 sm:$0xff]   ;;  %v1081_v4 = vld [vmem:[#allocation5 + $0x60] ss:$8 sps:$4 sm:$0xff]  }
  0x3f   :  { %210 = vmatpush1.bf16.msra.mxu0 %v1078_v2  ;;  %v1082_v5 = vld [vmem:[#allocation5 + $0x54] ss:$8 sps:$4 sm:$0xff]   ;;  %v1084_v6 = vld [vmem:[#allocation5 + $0x50] ss:$8 sps:$4 sm:$0xff]   ;;  %v1085_v7 = vld [vmem:[#allocation5 + $0x44] ss:$8 sps:$4 sm:$0xff]  }
  0x40   :  { %211 = vmatprep.subr.bf16.mxu0 %v1079_v3  ;;  %v1087_v8 = vld [vmem:[#allocation5 + $0x40] ss:$8 sps:$4 sm:$0xff]   ;;  %v1088_v9 = vld [vmem:[#allocation5 + $0x34] ss:$8 sps:$4 sm:$0xff]   ;;  %v1102_v11 = vld [vmem:[#allocation7 + $0x70] ss:$8 sps:$4 sm:$0xff]  }
  0x41   :  { %v1100_v10 = vld [vmem:[#allocation7 + $0x74] ss:$8 sps:$4 sm:$0xff]   ;;  %v1103_v12 = vld [vmem:[#allocation7 + $0x64] ss:$8 sps:$4 sm:$0xff]   ;;  %v1090_v13 = vld [vmem:[#allocation5 + $0x30] ss:$8 sps:$4 sm:$0xff]  }
  0x42   :  { %458 = vmatprep.subr.bf16.mxu1 %v1100_v10  ;;  %v1105_v14 = vld [vmem:[#allocation7 + $0x60] ss:$8 sps:$4 sm:$0xff]   ;;  %v1106_v15 = vld [vmem:[#allocation7 + $0x54] ss:$8 sps:$4 sm:$0xff]   ;;  %v1091_v16 = vld [vmem:[#allocation5 + $0x24] ss:$8 sps:$4 sm:$0xff]  }
  0x43   :  { %212 = vmatpush1.bf16.msra.mxu0 %v1081_v4  ;;  %459 = vmatpush1.bf16.msra.mxu1 %v1102_v11  ;;  %v1093_v17 = vld [vmem:[#allocation5 + $0x20] ss:$8 sps:$4 sm:$0xff]   ;;  %v1108_v18 = vld [vmem:[#allocation7 + $0x50] ss:$8 sps:$4 sm:$0xff]   ;;  %v1109_v19 = vld [vmem:[#allocation7 + $0x44] ss:$8 sps:$4 sm:$0xff]  }
  0x44   :  { %213 = vmatprep.subr.bf16.mxu0 %v1082_v5  ;;  %460 = vmatprep.subr.bf16.mxu1 %v1103_v12  ;;  %v1094_v20 = vld [vmem:[#allocation5 + $0x14] ss:$8 sps:$4 sm:$0xff]   ;;  %v1096_v21 = vld [vmem:[#allocation5 + $0x10] ss:$8 sps:$4 sm:$0xff]   ;;  %v1111_v22 = vld [vmem:[#allocation7 + $0x40] ss:$8 sps:$4 sm:$0xff]  }
  0x45   :  { %v1112_v23 = vld [vmem:[#allocation7 + $0x34] ss:$8 sps:$4 sm:$0xff]   ;;  %v1097_v24 = vld [vmem:[#allocation5 + $0x4] ss:$8 sps:$4 sm:$0xff]   ;;  %v1099_v25 = vld [vmem:[#allocation5] ss:$8 sps:$4 sm:$0xff]  }
  0x46   :  { %v1114_v26 = vld [vmem:[#allocation7 + $0x30] ss:$8 sps:$4 sm:$0xff]   ;;  %v1115_v27 = vld [vmem:[#allocation7 + $0x24] ss:$8 sps:$4 sm:$0xff]   ;;  %v100_v28 = vld [vmem:[#allocation2] sm:$0xf] }
  0x47   :  { %214 = vmatpush1.bf16.msra.mxu0 %v1084_v6  ;;  %461 = vmatpush1.bf16.msra.mxu1 %v1105_v14  ;;  %v1117_v29 = vld [vmem:[#allocation7 + $0x20] ss:$8 sps:$4 sm:$0xff]   ;;  %v1118_v30 = vld [vmem:[#allocation7 + $0x14] ss:$8 sps:$4 sm:$0xff]   ;;  %v1120_v31 = vld [vmem:[#allocation7 + $0x10] ss:$8 sps:$4 sm:$0xff]   ;;  %v119_v14 = vlaneseq }
  0x48   :  { %215 = vmatprep.subr.bf16.mxu0 %v1085_v7  ;;  %462 = vmatprep.subr.bf16.mxu1 %v1106_v15  ;;  %v1121_v32 = vld [vmem:[#allocation7 + $0x4] ss:$8 sps:$4 sm:$0xff]   ;;  %v1123_v33 = vld [vmem:[#allocation7] ss:$8 sps:$4 sm:$0xff]   ;;  %v1124_v34 = vld [vmem:[#allocation7 + $0xf4] ss:$8 sps:$4 sm:$0xff]  }
  0x49   :  { %v1126_v35 = vld [vmem:[#allocation7 + $0xf0] ss:$8 sps:$4 sm:$0xff]   ;;  %v1127_v36 = vld [vmem:[#allocation7 + $0xe4] ss:$8 sps:$4 sm:$0xff]   ;;  %v1129_v37 = vld [vmem:[#allocation7 + $0xe0] ss:$8 sps:$4 sm:$0xff]  }
  0x4a   :  { %v1130_v38 = vld [vmem:[#allocation7 + $0xd4] ss:$8 sps:$4 sm:$0xff]   ;;  %v1132_v39 = vld [vmem:[#allocation7 + $0xd0] ss:$8 sps:$4 sm:$0xff]   ;;  %v1133_v40 = vld [vmem:[#allocation7 + $0xc4] ss:$8 sps:$4 sm:$0xff]  }
  0x4b   :  { %216 = vmatpush1.bf16.msra.mxu0 %v1087_v8  ;;  %463 = vmatpush1.bf16.msra.mxu1 %v1108_v18  ;;  %v1135_v41 = vld [vmem:[#allocation7 + $0xc0] ss:$8 sps:$4 sm:$0xff]   ;;  %v1136_v42 = vld [vmem:[#allocation7 + $0xb4] ss:$8 sps:$4 sm:$0xff]   ;;  %v1138_v43 = vld [vmem:[#allocation7 + $0xb0] ss:$8 sps:$4 sm:$0xff]  }
  0x4c   :  { %217 = vmatprep.subr.bf16.mxu0 %v1088_v9  ;;  %464 = vmatprep.subr.bf16.mxu1 %v1109_v19  ;;  %v1139_v44 = vld [vmem:[#allocation7 + $0xa4] ss:$8 sps:$4 sm:$0xff]   ;;  %v1141_v45 = vld [vmem:[#allocation7 + $0xa0] ss:$8 sps:$4 sm:$0xff]   ;;  %v1142_v46 = vld [vmem:[#allocation7 + $0x94] ss:$8 sps:$4 sm:$0xff]  }
  0x4d   :  { %v1144_v47 = vld [vmem:[#allocation7 + $0x90] ss:$8 sps:$4 sm:$0xff]   ;;  %v1145_v48 = vld [vmem:[#allocation7 + $0x84] ss:$8 sps:$4 sm:$0xff]   ;;  %v1147_v49 = vld [vmem:[#allocation7 + $0x80] ss:$8 sps:$4 sm:$0xff]  }
  0x4e   :  { %v1148_v50 = vld [vmem:[#allocation8 + $0x70] ss:$8 sps:$4 sm:$0xff]   ;;  %v1150_v51 = vld [vmem:[#allocation8 + $0x74] ss:$8 sps:$4 sm:$0xff]   ;;  %v1153_v52 = vld [vmem:[#allocation8 + $0x64] ss:$8 sps:$4 sm:$0xff]  }
  0x4f   :  { %218 = vmatpush1.bf16.msra.mxu0 %v1090_v13  ;;  %465 = vmatpush1.bf16.msra.mxu1 %v1111_v22  ;;  %v1151_v53 = vld [vmem:[#allocation8 + $0x60] ss:$8 sps:$4 sm:$0xff]   ;;  %v1156_v54 = vld [vmem:[#allocation8 + $0x54] ss:$8 sps:$4 sm:$0xff]   ;;  %v1154_v55 = vld [vmem:[#allocation8 + $0x50] ss:$8 sps:$4 sm:$0xff]  }
  0x50   :  { %219 = vmatprep.subr.bf16.mxu0 %v1091_v16  ;;  %466 = vmatprep.subr.bf16.mxu1 %v1112_v23  ;;  %v1159_v56 = vld [vmem:[#allocation8 + $0x44] ss:$8 sps:$4 sm:$0xff]   ;;  %v1157_v57 = vld [vmem:[#allocation8 + $0x40] ss:$8 sps:$4 sm:$0xff]   ;;  %v1162_v58 = vld [vmem:[#allocation8 + $0x34] ss:$8 sps:$4 sm:$0xff]  }
  0x51   :  { %v1160_v59 = vld [vmem:[#allocation8 + $0x30] ss:$8 sps:$4 sm:$0xff]   ;;  %v1165_v60 = vld [vmem:[#allocation8 + $0x24] ss:$8 sps:$4 sm:$0xff]   ;;  %v1163_v61 = vld [vmem:[#allocation8 + $0x20] ss:$8 sps:$4 sm:$0xff]  }
  0x52   :  { %v1168_v62 = vld [vmem:[#allocation8 + $0x14] ss:$8 sps:$4 sm:$0xff]   ;;  %v1166_v63 = vld [vmem:[#allocation8 + $0x10] ss:$8 sps:$4 sm:$0xff]   ;;  %v1171_v0 = vld [vmem:[#allocation8 + $0x4] ss:$8 sps:$4 sm:$0xff]  }
  0x53   :  { %220 = vmatpush1.bf16.msra.mxu0 %v1093_v17  ;;  %467 = vmatpush1.bf16.msra.mxu1 %v1114_v26  ;;  %v1169_v1 = vld [vmem:[#allocation8] ss:$8 sps:$4 sm:$0xff]   ;;  %v1174_v2 = vld [vmem:[#allocation8 + $0xf4] ss:$8 sps:$4 sm:$0xff]   ;;  %v1172_v3 = vld [vmem:[#allocation8 + $0xf0] ss:$8 sps:$4 sm:$0xff]  }
  0x54   :  { %221 = vmatprep.subr.bf16.mxu0 %v1094_v20  ;;  %468 = vmatprep.subr.bf16.mxu1 %v1115_v27  ;;  %v1177_v4 = vld [vmem:[#allocation8 + $0xe4] ss:$8 sps:$4 sm:$0xff]   ;;  %v1175_v5 = vld [vmem:[#allocation8 + $0xe0] ss:$8 sps:$4 sm:$0xff]   ;;  %v1180_v6 = vld [vmem:[#allocation8 + $0xd4] ss:$8 sps:$4 sm:$0xff]  }
  0x55   :  { %v1178_v7 = vld [vmem:[#allocation8 + $0xd0] ss:$8 sps:$4 sm:$0xff]   ;;  %v1183_v8 = vld [vmem:[#allocation8 + $0xc4] ss:$8 sps:$4 sm:$0xff]   ;;  %v1181_v9 = vld [vmem:[#allocation8 + $0xc0] ss:$8 sps:$4 sm:$0xff]  }
  0x56   :  { %v1186_v10 = vld [vmem:[#allocation8 + $0xb4] ss:$8 sps:$4 sm:$0xff]   ;;  %v1184_v11 = vld [vmem:[#allocation8 + $0xb0] ss:$8 sps:$4 sm:$0xff]   ;;  %v1189_v12 = vld [vmem:[#allocation8 + $0xa4] ss:$8 sps:$4 sm:$0xff]  }
  0x57   :  { %222 = vmatpush1.bf16.msra.mxu0 %v1096_v21  ;;  %469 = vmatpush1.bf16.msra.mxu1 %v1117_v29  ;;  %v1187_v13 = vld [vmem:[#allocation8 + $0xa0] ss:$8 sps:$4 sm:$0xff]   ;;  %v120_v15 = vshrl.u32 %v119_v14, 7  ;;  %v117_v17 = vld [vmem:[%s1454_s2] sm:$0x3] }
  0x58   :  { %223 = vmatprep.subr.bf16.mxu0 %v1097_v24  ;;  %470 = vmatprep.subr.bf16.mxu1 %v1118_v30  ;;  %v1026_v14 = vld [vmem:[%s1460_s8] ss:$0 sm:$0xff] }
  0x59   :  { %v1427_v16 = vsub.s32 0, %v120_v15  ;;  %v1432_v18 = vsub.s32 1, %v120_v15 }
  0x5b   :  { %224 = vmatpush1.bf16.msra.mxu0 %v1099_v25  ;;  %471 = vmatpush1.bf16.msra.mxu1 %v1120_v31  ;;  %v122_v19 = vrot.slane %v117_v17, %v1427_v16  ;;  %v126_v20 = vrot.slane %v117_v17, %v1432_v18  ;;  %v1192_v31 = vld [vmem:[#allocation8 + $0x94] ss:$8 sps:$4 sm:$0xff]  }
  0x5c   :  { %472 = vmatprep.subr.bf16.mxu1 %v1121_v32  ;;  %707 = vmatprep.subr.bf16.mxu0 %v1150_v51  ;;  %v1190_v32 = vld [vmem:[#allocation8 + $0x90] ss:$8 sps:$4 sm:$0xff]  }
  0x5e   :  { %242 = vmatmul.mubr.bf16.vlgmr.msra.gmra.mxu0 %v100_v28 }
  0x5f   :  { %473 = vmatpush1.bf16.msra.mxu1 %v1123_v33  ;;  %708 = vmatpush1.bf16.msra.mxu0 %v1148_v50  ;;  %v1195_v33 = vld [vmem:[#allocation8 + $0x84] ss:$8 sps:$4 sm:$0xff]  }
  0x60   :  { %474 = vmatprep.subr.bf16.mxu1 %v1124_v34  ;;  %709 = vmatprep.subr.bf16.mxu0 %v1153_v52  ;;  %v1193_v34 = vld [vmem:[#allocation8 + $0x80] ss:$8 sps:$4 sm:$0xff]  }
  0x63   :  { %475 = vmatpush2.bf16.msra.mxu1 %v1126_v35  ;;  %710 = vmatpush1.bf16.msra.mxu0 %v1151_v53  ;;  %v1196_v35 = vld [vmem:[#allocation10 + $0x78] sm:$0xff]  }
  0x64   :  { %476 = vmatprep.subr.bf16.mxu1 %v1127_v36  ;;  %711 = vmatprep.subr.bf16.mxu0 %v1156_v54  ;;  %v1197_v36 = vld [vmem:[#allocation10 + $0x38] sm:$0xff]  }
  0x67   :  { %477 = vmatpush2.bf16.msra.mxu1 %v1129_v37  ;;  %712 = vmatpush1.bf16.msra.mxu0 %v1154_v55  ;;  %v1198_v37 = vld [vmem:[#allocation10 + $0x70] sm:$0xff]  }
  0x68   :  { %478 = vmatprep.subr.bf16.mxu1 %v1130_v38  ;;  %713 = vmatprep.subr.bf16.mxu0 %v1159_v56  ;;  %v1199_v38 = vld [vmem:[#allocation10 + $0x30] sm:$0xff]  }
  0x6b   :  { %479 = vmatpush2.bf16.msra.mxu1 %v1132_v39  ;;  %714 = vmatpush1.bf16.msra.mxu0 %v1157_v57  ;;  %v1200_v39 = vld [vmem:[#allocation10 + $0x68] sm:$0xff]  }
  0x6c   :  { %480 = vmatprep.subr.bf16.mxu1 %v1133_v40  ;;  %715 = vmatprep.subr.bf16.mxu0 %v1162_v58  ;;  %v1201_v40 = vld [vmem:[#allocation10 + $0x28] sm:$0xff]  }
  0x6f   :  { %481 = vmatpush2.bf16.msra.mxu1 %v1135_v41  ;;  %716 = vmatpush1.bf16.msra.mxu0 %v1160_v59  ;;  %v1202_v41 = vld [vmem:[#allocation10 + $0x60] sm:$0xff]  }
  0x70   :  { %482 = vmatprep.subr.bf16.mxu1 %v1136_v42  ;;  %717 = vmatprep.subr.bf16.mxu0 %v1165_v60  ;;  %v1203_v42 = vld [vmem:[#allocation10 + $0x20] sm:$0xff]   ;;  %v1208_v60 = vld [vmem:[#allocation10 + $0x48] sm:$0xff]  }
  0x73   :  { %483 = vmatpush2.bf16.msra.mxu1 %v1138_v43  ;;  %718 = vmatpush1.bf16.msra.mxu0 %v1163_v61  ;;  %v1204_v43 = vld [vmem:[#allocation10 + $0x58] sm:$0xff]   ;;  %v1209_v61 = vld [vmem:[#allocation10 + $0x8] sm:$0xff]  }
  0x74   :  { %484 = vmatprep.subr.bf16.mxu1 %v1139_v44  ;;  %719 = vmatprep.subr.bf16.mxu0 %v1168_v62  ;;  %v1205_v44 = vld [vmem:[#allocation10 + $0x18] sm:$0xff]   ;;  %v1210_v62 = vld [vmem:[#allocation10 + $0x40] sm:$0xff]  }
  0x77   :  { %485 = vmatpush2.bf16.msra.mxu1 %v1141_v45  ;;  %720 = vmatpush1.bf16.msra.mxu0 %v1166_v63  ;;  %v1206_v45 = vld [vmem:[#allocation10 + $0x50] sm:$0xff]   ;;  %v1211_v63 = vld [vmem:[#allocation10] sm:$0xff]  }
  0x78   :  { %486 = vmatprep.subr.bf16.mxu1 %v1142_v46  ;;  %721 = vmatprep.subr.bf16.mxu0 %v1171_v0  ;;  %v1207_v46 = vld [vmem:[#allocation10 + $0x10] sm:$0xff]   ;;  %v535_v0 = vld [vmem:[%s1458_s6] sm:$0x3]  ;;  %s1352_s6 = smov [#allocation11]  }
  0x79   :  { %s935_s18 = sshll.u32 %s1352_s6, 4  ;;  %s936_s18 = int_to_ptr.vmem [resolvable:$true] %s935_s18 }
  0x7a   :  { %s1314_s19 = scalar_lea.vmem %s936_s18, 128  ;;  %p1319_p12 = scmp.lt.s32.totalorder %s936_s18, %s936_s18 }
  0x7b   :  { %487 = vmatpush2.bf16.msra.mxu1 %v1144_v47  ;;  %722 = vmatpush1.bf16.msra.mxu0 %v1169_v1  ;;  %v286_v47 = vld [vmem:[%s1456_s4] sm:$0x3]  ;;  %v540_v1 = vrot.slane %v535_v0, %v1427_v16  ;;  %p1315_p11 = scmp.ne.s32.totalorder %s936_s18, %s1314_s19  ;;  %p1320_p13 = scmp.lt.s32.totalorder %s1314_s19, %s1314_s19 }
  0x7c   :  { %488 = vmatprep.subr.bf16.mxu1 %v1145_v48  ;;  %723 = vmatprep.subr.bf16.mxu0 %v1174_v2  ;;  %v291_v48 = vrot.slane %v286_v47, %v1427_v16  ;;  %v544_v2 = vrot.slane %v535_v0, %v1432_v18 }
  0x7d   :  { %p1321_p0 = por %p1320_p13, %p1319_p12 }
  0x7f   :  { %489 = vmatpush2.bf16.msra.mxu1 %v1147_v49  ;;  %724 = vmatpush2.bf16.msra.mxu0 %v1172_v3  ;;  %v295_v49 = vrot.slane %v286_v47, %v1432_v18  ;;  %p1322_p1 = pnand %p1321_p0, %p1315_p11 }
  0x80   :  { %725 = vmatprep.subr.bf16.mxu0 %v1177_v4  ;;  %1043 = vmatprep.subr.bf16.mxu1 %v1196_v35 }
  0x83   :  { %726 = vmatpush2.bf16.msra.mxu0 %v1175_v5 }
  0x84   :  { %727 = vmatprep.subr.bf16.mxu0 %v1180_v6 }
  0x87   :  { %728 = vmatpush2.bf16.msra.mxu0 %v1178_v7 }
  0x88   :  { %729 = vmatprep.subr.bf16.mxu0 %v1183_v8 }
  0x8b   :  { %730 = vmatpush2.bf16.msra.mxu0 %v1181_v9 }
  0x8c   :  { %731 = vmatprep.subr.bf16.mxu0 %v1186_v10 }
  0x8f   :  { %732 = vmatpush2.bf16.msra.mxu0 %v1184_v11 }
  0x90   :  { %733 = vmatprep.subr.bf16.mxu0 %v1189_v12 }
  0x93   :  { %734 = vmatpush2.bf16.msra.mxu0 %v1187_v13 }
  0x94   :  { %735 = vmatprep.subr.bf16.mxu0 %v1192_v31 }
  0x97   :  { %736 = vmatpush2.bf16.msra.mxu0 %v1190_v32 }
  0x98   :  { %737 = vmatprep.subr.bf16.mxu0 %v1195_v33 }
  0x9b   :  { %738 = vmatpush2.bf16.msra.mxu0 %v1193_v34 }
 0x11e   :  { %v243_v21 = vpop.f32.mrf.mxu0 }
 0x11f   :  { %v244_v22 = vadd.f32 %v243_v21, %v122_v19 }
 0x120   :  { %v245_v23 = vpop.f32.mrf.mxu0 }
 0x121   :  { %v246_v24 = vadd.f32 %v245_v23, %v126_v20  ;;  %v250_v25 = vmax.f32 %v244_v22, 0.0 }
 0x122   :  { %v247_v26 = vpop.f32.mrf.mxu0 }
 0x123   :  { %v251_v27 = vmax.f32 %v246_v24, 0.0  ;;  %v252_v30 = vpack.c.bf16 %v250_v25, %v250_v25 }
 0x124   :  { %v248_v28 = vpop.f32.mrf.mxu0 }
 0x125   :  { %v253_v29 = vpack.c.bf16 %v251_v27, %v251_v27 }
 0x127   :  { %490 = vmatprep.mubr.bf16.mxu1 %v253_v29 }
 0x128   :  { %491 = vmatmul.mubr.bf16.vlgmr.msra.gmra.mxu1 %v252_v30 }
 0x129   :  { %1044 = vmatpush3.bf16.msra.mxu1 %v1197_v36 }
 0x12a   :  { %1045 = vmatprep.subr.bf16.mxu1 %v1198_v37 }
 0x12d   :  { %1046 = vmatpush3.bf16.msra.mxu1 %v1199_v38 }
 0x12e   :  { %1047 = vmatprep.subr.bf16.mxu1 %v1200_v39 }
 0x131   :  { %1048 = vmatpush3.bf16.msra.mxu1 %v1201_v40 }
 0x132   :  { %1049 = vmatprep.subr.bf16.mxu1 %v1202_v41 }
 0x135   :  { %1050 = vmatpush3.bf16.msra.mxu1 %v1203_v42 }
 0x136   :  { %1051 = vmatprep.subr.bf16.mxu1 %v1204_v43 }
 0x139   :  { %1052 = vmatpush3.bf16.msra.mxu1 %v1205_v44 }
 0x13a   :  { %1053 = vmatprep.subr.bf16.mxu1 %v1206_v45 }
 0x13d   :  { %1054 = vmatpush3.bf16.msra.mxu1 %v1207_v46 }
 0x13e   :  { %1055 = vmatprep.subr.bf16.mxu1 %v1208_v60 }
 0x141   :  { %1056 = vmatpush3.bf16.msra.mxu1 %v1209_v61 }
 0x142   :  { %1057 = vmatprep.subr.bf16.mxu1 %v1210_v62 }
 0x145   :  { %1058 = vmatpush3.bf16.msra.mxu1 %v1211_v63 }
 0x1e8   :  { %v492_v50 = vpop.f32.mrf.mxu1 }
 0x1e9   :  { %v493_v51 = vadd.f32 %v492_v50, %v291_v48 }
 0x1ea   :  { %v494_v52 = vpop.f32.mrf.mxu1 }
 0x1eb   :  { %v495_v53 = vadd.f32 %v494_v52, %v295_v49  ;;  %v499_v54 = vmax.f32 %v493_v51, 0.0 }
 0x1ec   :  { %v496_v55 = vpop.f32.mrf.mxu1 }
 0x1ed   :  { %v500_v56 = vmax.f32 %v495_v53, 0.0  ;;  %v501_v59 = vpack.c.bf16 %v499_v54, %v499_v54 }
 0x1ee   :  { %v497_v57 = vpop.f32.mrf.mxu1 }
 0x1ef   :  { %v502_v58 = vpack.c.bf16 %v500_v56, %v500_v56 }
 0x1f1   :  { %739 = vmatprep.mubr.bf16.mxu0 %v502_v58 }
 0x1f2   :  { %740 = vmatmul.mubr.bf16.vlgmr.msra.gmra.mxu0 %v501_v59 }
 0x2b2   :  { %v741_v3 = vpop.f32.mrf.mxu0 }
 0x2b3   :  { %v742_v4 = vadd.f32 %v741_v3, %v540_v1 }
 0x2b4   :  { %v743_v5 = vpop.f32.mrf.mxu0 }
 0x2b5   :  { %v744_v6 = vadd.f32 %v743_v5, %v544_v2  ;;  %v748_v7 = vmax.f32 %v742_v4, 0.0 }
 0x2b6   :  { %v745_v8 = vpop.f32.mrf.mxu0 }
 0x2b7   :  { %v749_v9 = vmax.f32 %v744_v6, 0.0  ;;  %v750_v12 = vpack.c.bf16 %v748_v7, %v748_v7 }
 0x2b8   :  { %v746_v10 = vpop.f32.mrf.mxu0 }
 0x2b9   :  { %v751_v11 = vpack.c.bf16 %v749_v9, %v749_v9 }
 0x2bb   :  { %919 = vmatprep.mubr.bf16.mxu1 %v751_v11 }
 0x2bc   :  { %920 = vmatmul.mubr.bf16.vlgmr.msra.gmra.mxu1 %v750_v12 }
 0x37c   :  { %v1059_v13 = vpop.f32.mrf.mxu1 }
 0x37e   :  { %v1060_v15 = vpop.f32.mrf.mxu1 }
 0x37f   :  { %v1061_v16 = vadd.f32 %v1060_v15, %v1059_v13 }
 0x380   :  { %v1062_v17 = vpop.f32.mrf.mxu1 }
 0x381   :  { %v922_v18 = vadd.f32 %v1061_v16, %v1026_v14 }
 0x382   :  { %v1063_v19 = vpop.f32.mrf.mxu1 }
 0x383   :  { %1212 = vtanh.f32 %v922_v18 }
 0x390   :  { %v1213_v20 = vpop.eup %1212 }
 0x391   :  { %928 = vst [vmem:[#allocation11] sm:$0xff] %v1213_v20 }
 0x392   :  { %1325 = shalt.err (!%p1322_p1)
}
 0x393   :  { %938 = dma.vmem_to_hbm [thread:$0]  %s936_s18, 128, %s1461_s9, [#allocation4]  }
 0x394   :  { %1340 = dma.done.wait [#allocation4], 128  }
 0x395   :  { %1341 = vsyncadd [#allocation4], 4294967168 }
 0x396   :  { %942 = vsyncpa [#allocation3], 1 }
 0x397   :  { %943 = vsyncpa [#allocation6], 1 }
 0x398   :  { %944 = vsyncpa [#allocation9], 1 }
 0x399   :  { %945 = vsyncpa [#allocation4], 1 }

</bundles_post_ra>
